<compile_context>
chip_gen: v7x
topology: tpu7x:2x2x1
jax: 0.10.0
libtpu: 0.0.40
codegen_flags: <defaults>
</compile_context>

<pallas_src>
import numpy as np
import jax
import jax.numpy as jnp
from jax import lax
from jax.experimental import pallas as pl
from jax.experimental.pallas import tpu as pltpu

# ----------------------------- configuration (small) -----------------------------
CONFIG = dict(
    graphNet="GAT_GCN",
    graph_output_dim=64,
    graph_features_dim=8,
    seq_embed_dim=64,
    n_filters=32,
    seq_output_dim=64,
    dropout=0.2,
)

GAT_HEADS = 10
N_GRAPHS = 2
NODES_PER_GRAPH = 8
N_NODES = N_GRAPHS * NODES_PER_GRAPH
SEQ_LEN = 128                  # conv/pool stack: 128 -> 62 -> 29 -> 12 -> 5
SEQ_KERNELS = (5, 5, 5, 3)
FC_G1_PAD = 1536               # 1500 padded to a multiple of 128 (lane-dense tiles)

# Resolved at runtime by _probe_roll_semantics(); jnp.roll convention assumed.
_ROLL_LIKE_JNP = True


def _seq_layer_dims():
    """Per conv layer: (input buffer rows, output buffer rows, valid pooled rows)."""
    dims = []
    lv = lbuf = SEQ_LEN
    for k in SEQ_KERNELS:
        lp = (lv - k + 1) // 2          # valid conv length // 2 (floor pool)
        lbuf_out = max(8, -(-lp // 8) * 8)
        dims.append((lbuf, lbuf_out, lp))
        lv, lbuf = lp, lbuf_out
    return dims


def _roll_up(arr, k):
    """out[i] = arr[(i + k) % L] along axis 0 (sublanes) via one XLU rotation."""
    L = arr.shape[0]
    shift = (L - k) % L if _ROLL_LIKE_JNP else k % L
    return pltpu.roll(arr, shift=shift, axis=0)


# ----------------------------- fused model kernel --------------------------------
def _dgsdta_kernel(
    # graph data
    x_ref, xt_ref, adj_ref, bm_ref, bmt_ref, invc_ref,
    # GAT layout constants (host precomputed one-hot / block masks)
    r_ref, m_ref, mt_ref, hm_ref,
    # graph params
    gatw_ref, psrc_ref, qdstT_ref, gatb_ref, gcnw_ref, gcnb_ref,
    g1w_ref, g1b_ref, g2w_ref, g2b_ref,
    # sequence data + params
    seq_ref,
    c1w_ref, c1b_ref, c2w_ref, c2b_ref, c3w_ref, c3b_ref, c4w_ref, c4b_ref,
    s1_ref, s2_ref, s3_ref, s4_ref,
    fxw_ref, fxb_ref,
    # head params
    f1w_ref, f1b_ref, f2w_ref, f2b_ref, ow_ref, ob_ref,
    # output
    o_ref,
):
    f32 = jnp.float32
    bf16 = jnp.bfloat16
    N = x_ref.shape[0]
    HC = gatw_ref.shape[1]
    B = bm_ref.shape[0]

    x = x_ref[...]                                                    # (N, F)
    xt = xt_ref[...]                                                  # (F, N)
    adj = adj_ref[...]                                                # (N, N)
    Rsel = r_ref[...]                                                 # (H*N, H)
    Msel = m_ref[...]                                                 # (H*N, N)

    # ---- GATConv: all 10 heads batched along sublanes as one (H*N, N) block ----
    xl = jnp.dot(x, gatw_ref[...], preferred_element_type=f32)        # (N, H*C)
    a_srcT = jnp.dot(psrc_ref[...], xt, preferred_element_type=f32)   # (H, N)
    a_dstT = jnp.dot(qdstT_ref[...], xt, preferred_element_type=f32)  # (H, N)

    src_all = jnp.dot(Rsel, a_srcT, preferred_element_type=f32)       # (HN, N)
    dst_rows = jnp.dot(Rsel, a_dstT, preferred_element_type=f32)      # (HN, N)
    dst_col = jnp.sum(dst_rows * Msel, axis=1, keepdims=True)         # (HN, 1)
    adj_all = jnp.dot(Msel, adj, preferred_element_type=f32)          # (HN, N)

    e = src_all + dst_col                                             # e[hN+i, j]
    e = jnp.where(e >= 0, e, 0.2 * e)                                 # LeakyReLU(0.2)
    e = jnp.where(adj_all > 0, e, jnp.float32(-1e30))                 # mask non-edges
    e = e - jnp.max(e, axis=1, keepdims=True)
    p = jnp.exp(e)
    attn = p * pl.reciprocal(jnp.sum(p, axis=1, keepdims=True), approx=True)

    # per-head aggregation as 2 matmuls + 1 block mask (no per-head loop)
    agg = jnp.dot(attn, xl, preferred_element_type=f32) * hm_ref[...] # (HN, HC)
    x1 = jnp.dot(mt_ref[...], agg, preferred_element_type=f32)        # (N, HC)
    x1 = jnp.maximum(x1 + gatb_ref[...], 0.0)

    # ---- GCNConv, symmetric normalisation on (A + I) (undirected graphs) --------
    deg_r = jnp.sum(adj, axis=1, keepdims=True)                       # lane reduce
    deg_c = jnp.dot(jnp.ones((1, N), f32), adj,
                    preferred_element_type=f32)                       # MXU ones-row
    a_norm = adj * lax.rsqrt(deg_r) * lax.rsqrt(deg_c)
    hgc = jnp.dot(x1, gcnw_ref[...], preferred_element_type=f32)
    x2 = jnp.maximum(jnp.dot(a_norm, hgc, preferred_element_type=f32)
                     + gcnb_ref[...], 0.0)                            # (N, HC)

    # ---- global max + mean pooling per graph ------------------------------------
    bm = bm_ref[...]                                                  # (B, N)
    bmt = bmt_ref[...]                                                # (N, B)
    xmean = jnp.dot(bm, x2, preferred_element_type=f32) * invc_ref[...]
    rows = []
    for b in range(B):                                                # B = 2, static
        masked = jnp.where(bmt[:, b:b + 1] > 0, x2, jnp.float32(-3e38))
        rows.append(jnp.max(masked, axis=0, keepdims=True))
    xmax = jnp.concatenate(rows, axis=0)                              # (B, HC)

    # ---- fc_g1 (padded 1536) + ReLU -> fc_g2, bf16 weights / f32 accumulate -----
    xmax_b = xmax.astype(bf16)
    xmean_b = xmean.astype(bf16)
    h1 = (jnp.dot(xmax_b, g1w_ref[pl.ds(0, HC), :], preferred_element_type=f32)
          + jnp.dot(xmean_b, g1w_ref[pl.ds(HC, HC), :], preferred_element_type=f32)
          + g1b_ref[...])
    h1 = jnp.maximum(h1, 0.0)                                         # (B, 1536)
    xg = (jnp.dot(h1.astype(bf16), g2w_ref[...],
                  preferred_element_type=f32) + g2b_ref[...])         # (B, go)

    # ---- sequence branch: conv taps via roll, fused ReLU+MaxPool via selection --
    def conv_relu_pool(xb, w_ref, b_ref, sel_ref):
        K = w_ref.shape[0]
        acc = jnp.dot(xb, w_ref[0], preferred_element_type=f32)       # (Lbuf, Cout)
        for k in range(1, K):                                         # static taps
            contrib = jnp.dot(xb, w_ref[k], preferred_element_type=f32)
            acc = acc + _roll_up(contrib, k)                          # align tap k
        ymax = jnp.maximum(acc, _roll_up(acc, 1))                     # pairwise max
        pooled = jnp.dot(sel_ref[...], ymax,
                         preferred_element_type=f32)                  # pick even rows
        return jnp.maximum(pooled + b_ref[...], 0.0)                  # + bias, ReLU

    Cf = c4w_ref.shape[2]
    LF = fxw_ref.shape[0] // Cf
    xts = []
    for b in range(B):                                                # B = 2, static
        p1 = conv_relu_pool(seq_ref[b], c1w_ref, c1b_ref, s1_ref)     # (64, 32)
        p2 = conv_relu_pool(p1, c2w_ref, c2b_ref, s2_ref)             # (32, 64)
        p3 = conv_relu_pool(p2, c3w_ref, c3b_ref, s3_ref)             # (16, 32)
        p4 = conv_relu_pool(p3, c4w_ref, c4b_ref, s4_ref)             # (8, 16)
        # fc_xt over the channel-major flatten (wf rows pre-permuted to (l, c) order).
        # Kept as LF=5 tiny matmuls: Mosaic dot lowering has no multi-dim contraction.
        acc = fxb_ref[...]                                            # (1, so)
        for l in range(LF):
            acc = acc + jnp.dot(p4[l:l + 1, :], fxw_ref[pl.ds(l * Cf, Cf), :],
                                preferred_element_type=f32)
        xts.append(jnp.maximum(acc, 0.0))
    xt_seq = jnp.concatenate(xts, axis=0)                             # (B, so)

    # ---- head: lane-dense (B, 128) concat -> fc1 -> fc2 -> out ------------------
    xc = jnp.concatenate([xg, xt_seq], axis=1).astype(bf16)           # (B, 128)
    h = jnp.maximum(jnp.dot(xc, f1w_ref[...], preferred_element_type=f32)
                    + f1b_ref[...], 0.0)                              # (B, 1024)
    h = jnp.maximum(jnp.dot(h.astype(bf16), f2w_ref[...],
                            preferred_element_type=f32) + f2b_ref[...], 0.0)
    o_ref[...] = jnp.dot(h, ow_ref[...], preferred_element_type=f32) + ob_ref[...]


@jax.jit
def dgsdta_forward(pp, consts, graph_x, adj, bmask, bmask_t, inv_counts, seq_embed):
    B = bmask.shape[0]
    args = (
        # graph data
        graph_x, jnp.transpose(graph_x), adj, bmask, bmask_t, inv_counts,
        # GAT layout constants
        consts["R"], consts["M"], consts["MT"], consts["HM"],
        # graph params
        pp["gat_w"], pp["gat_p_src"], pp["gat_q_dstT"], pp["gat_b"],
        pp["gcn_w"], pp["gcn_b"],
        pp["fc_g1_w"], pp["fc_g1_b"], pp["fc_g2_w"], pp["fc_g2_b"],
        # sequence data + params
        seq_embed,
        pp["c1_w"], pp["c1_b"], pp["c2_w"], pp["c2_b"],
        pp["c3_w"], pp["c3_b"], pp["c4_w"], pp["c4_b"],
        consts["sel1"], consts["sel2"], consts["sel3"], consts["sel4"],
        pp["fc_xt_w"], pp["fc_xt_b"],
        # head params
        pp["fc1_w"], pp["fc1_b"], pp["fc2_w"], pp["fc2_b"],
        pp["out_w"], pp["out_b"],
    )
    # Single invocation, no grid: every operand is mapped whole into VMEM exactly
    # once (no double-buffer prologue), everything stays on-chip until the (B,1)
    # output store.
    return pl.pallas_call(
        _dgsdta_kernel,
        out_shape=jax.ShapeDtypeStruct((B, 1), jnp.float32),
    )(*args)


# ----------------------------- params / constants --------------------------------
def init_params(key):
    F = CONFIG["graph_features_dim"]
    H = GAT_HEADS
    go = CONFIG["graph_output_dim"]
    E = CONFIG["seq_embed_dim"]
    NF = CONFIG["n_filters"]
    so = CONFIG["seq_output_dim"]

    L = SEQ_LEN
    for k in SEQ_KERNELS:
        L = (L - k + 1) // 2
    flat = (NF // 2) * L   # generalizes the hard-coded 128*61 of the reference module

    def nrm(k, shape):
        return (0.1 * jax.random.normal(k, shape)).astype(jnp.float32)

    ki = iter(jax.random.split(key, 40))
    return {
        # GAT_GCN
        "gat_w": nrm(next(ki), (F, H * F)),
        "gat_att_src": nrm(next(ki), (H, F)),
        "gat_att_dst": nrm(next(ki), (H, F)),
        "gat_b": nrm(next(ki), (H * F,)),
        "gcn_w": nrm(next(ki), (H * F, H * F)),
        "gcn_b": nrm(next(ki), (H * F,)),
        "fc_g1_w": nrm(next(ki), (H * F * 2, 1500)),
        "fc_g1_b": nrm(next(ki), (1500,)),
        "fc_g2_w": nrm(next(ki), (1500, go)),
        "fc_g2_b": nrm(next(ki), (go,)),
        # SeqNet (conv weights stored as (K, Cin, Cout))
        "c1_w": nrm(next(ki), (5, E, NF)), "c1_b": nrm(next(ki), (NF,)),
        "c2_w": nrm(next(ki), (5, NF, E)), "c2_b": nrm(next(ki), (E,)),
        "c3_w": nrm(next(ki), (5, E, NF)), "c3_b": nrm(next(ki), (NF,)),
        "c4_w": nrm(next(ki), (3, NF, NF // 2)), "c4_b": nrm(next(ki), (NF // 2,)),
        "fc_xt_w": nrm(next(ki), (flat, so)), "fc_xt_b": nrm(next(ki), (so,)),
        # head
        "fc1_w": nrm(next(ki), (go + so, 1024)), "fc1_b": nrm(next(ki), (1024,)),
        "fc2_w": nrm(next(ki), (1024, 256)), "fc2_b": nrm(next(ki), (256,)),
        "out_w": nrm(next(ki), (256, 1)), "out_b": nrm(next(ki), (1,)),
    }


def prepare_params(p):
    """Fold the GAT attention vectors into small matrices, pad fc_g1 to 1536,
    permute fc_xt rows to the in-kernel flatten order, cast big weights to bf16."""
    F = CONFIG["graph_features_dim"]
    H, C = GAT_HEADS, F
    so = CONFIG["seq_output_dim"]

    # a_src = x @ q_src, a_dst = x @ q_dst  (att folded through the GAT linear map)
    w3 = p["gat_w"].reshape(F, H, C)                       # gat_w[f, h*C + c]
    q_src = jnp.einsum("fhc,hc->fh", w3, p["gat_att_src"])
    q_dst = jnp.einsum("fhc,hc->fh", w3, p["gat_att_dst"])

    pad = FC_G1_PAD - p["fc_g1_w"].shape[1]
    g1w = jnp.pad(p["fc_g1_w"], ((0, 0), (0, pad)))
    g1b = jnp.pad(p["fc_g1_b"], ((0, pad),))
    g2w = jnp.pad(p["fc_g2_w"], ((0, pad), (0, 0)))

    # fc_xt: torch flattens (C, L); kernel produces (L, C) rows -> permute rows once.
    flat = p["fc_xt_w"].shape[0]
    Cf = p["c4_w"].shape[2]
    Lf = flat // Cf
    wf = p["fc_xt_w"].reshape(Cf, Lf, so).transpose(1, 0, 2).reshape(Lf * Cf, so)

    row = lambda b: b.reshape(1, -1).astype(jnp.float32)
    bf16 = jnp.bfloat16
    return {
        "gat_w": p["gat_w"],
        "gat_p_src": jnp.transpose(q_src),                 # (H, F)
        "gat_q_dstT": jnp.transpose(q_dst),                # (H, F)
        "gat_b": row(p["gat_b"]),
        "gcn_w": p["gcn_w"], "gcn_b": row(p["gcn_b"]),
        "fc_g1_w": g1w.astype(bf16), "fc_g1_b": row(g1b),
        "fc_g2_w": g2w.astype(bf16), "fc_g2_b": row(p["fc_g2_b"]),
        "c1_w": p["c1_w"], "c1_b": row(p["c1_b"]),
        "c2_w": p["c2_w"], "c2_b": row(p["c2_b"]),
        "c3_w": p["c3_w"], "c3_b": row(p["c3_b"]),
        "c4_w": p["c4_w"], "c4_b": row(p["c4_b"]),
        "fc_xt_w": wf, "fc_xt_b": row(p["fc_xt_b"]),
        "fc1_w": p["fc1_w"].astype(bf16), "fc1_b": row(p["fc1_b"]),
        "fc2_w": p["fc2_w"].astype(bf16), "fc2_b": row(p["fc2_b"]),
        "out_w": p["out_w"], "out_b": row(p["out_b"]),
    }


def build_constants():
    """Static one-hot / mask / selection matrices consumed by the fused kernel."""
    N, H, C = N_NODES, GAT_HEADS, CONFIG["graph_features_dim"]
    HN, HC = H * N, H * C
    rows = np.arange(HN)
    R = np.zeros((HN, H), np.float32)
    R[rows, rows // N] = 1.0                               # head one-hot
    M = np.zeros((HN, N), np.float32)
    M[rows, rows % N] = 1.0                                # node one-hot
    HM = (rows[:, None] // N == np.arange(HC)[None, :] // C).astype(np.float32)
    consts = {"R": jnp.asarray(R), "M": jnp.asarray(M),
              "MT": jnp.asarray(np.ascontiguousarray(M.T)), "HM": jnp.asarray(HM)}
    # MaxPool even-row selection matrices (one per conv layer).
    for i, (lin, lout, nv) in enumerate(_seq_layer_dims(), start=1):
        s = np.zeros((lout, lin), np.float32)
        s[np.arange(nv), 2 * np.arange(nv)] = 1.0
        consts[f"sel{i}"] = jnp.asarray(s)
    return consts


def build_graph_structure():
    """Two ring graphs of 8 nodes each; dense undirected adjacency with self-loops."""
    src, dst = [], []
    for g in range(N_GRAPHS):
        base = g * NODES_PER_GRAPH
        for i in range(NODES_PER_GRAPH):
            a = base + i
            b = base + (i + 1) % NODES_PER_GRAPH
            src += [a, b]
            dst += [b, a]
    adj = jnp.zeros((N_NODES, N_NODES), jnp.float32)
    adj = adj.at[jnp.array(dst), jnp.array(src)].set(1.0)   # adj[target, source]
    adj = jnp.minimum(adj + jnp.eye(N_NODES, dtype=jnp.float32), 1.0)

    batch = jnp.repeat(jnp.arange(N_GRAPHS), NODES_PER_GRAPH)                        # (N,)
    bmask = (jnp.arange(N_GRAPHS)[:, None] == batch[None, :]).astype(jnp.float32)    # (B, N)
    return adj, bmask, jnp.transpose(bmask)


# ----------------------------- pure-JAX reference (for validation) ---------------
def reference_forward(pp, graph_x, adj, bmask, bmask_t, inv_counts, seq_embed):
    f32, bf16 = jnp.float32, jnp.bfloat16
    N, F = graph_x.shape
    H, C = GAT_HEADS, F
    B = bmask.shape[0]

    # GAT (per-head, f32, bf16 casts mirrored where the kernel uses them)
    xl = graph_x @ pp["gat_w"]
    a_src = graph_x @ jnp.transpose(pp["gat_p_src"])        # (N, H)
    a_dst = graph_x @ jnp.transpose(pp["gat_q_dstT"])       # (N, H)
    outs = []
    for h in range(H):
        e = a_dst[:, h:h + 1] + a_src[:, h][None, :]
        e = jnp.where(e >= 0, e, 0.2 * e)
        e = jnp.where(adj > 0, e, -1e30)
        e = e - jnp.max(e, axis=1, keepdims=True)
        p = jnp.exp(e)
        attn = p / jnp.sum(p, axis=1, keepdims=True)
        outs.append(attn @ xl[:, h * C:(h + 1) * C])
    x1 = jnp.maximum(jnp.concatenate(outs, axis=1) + pp["gat_b"], 0.0)

    # GCN
    dinv = lax.rsqrt(jnp.sum(adj, axis=1))
    a_norm = adj * dinv[:, None] * dinv[None, :]
    x2 = jnp.maximum(a_norm @ (x1 @ pp["gcn_w"]) + pp["gcn_b"], 0.0)

    xmean = (bmask @ x2) * inv_counts
    xmax = jnp.stack([jnp.max(jnp.where(bmask_t[:, b:b + 1] > 0, x2, -3e38), axis=0)
                      for b in range(B)], axis=0)
    xcat = jnp.concatenate([xmax, xmean], axis=1).astype(bf16)
    h1 = jnp.maximum(jnp.dot(xcat, pp["fc_g1_w"], preferred_element_type=f32)
                     + pp["fc_g1_b"], 0.0)
    xg = jnp.dot(h1.astype(bf16), pp["fc_g2_w"], preferred_element_type=f32) + pp["fc_g2_b"]

    # SeqNet
    def conv_valid(xb, w):
        K = w.shape[0]
        L_out = xb.shape[0] - K + 1
        return sum(xb[k:k + L_out] @ w[k] for k in range(K))

    def pool2(y):
        Lp = y.shape[0] // 2
        return jnp.maximum(y[0:2 * Lp:2], y[1:2 * Lp:2])

    xts = []
    for b in range(B):
        t = seq_embed[b]
        for name in ("c1", "c2", "c3", "c4"):
            t = pool2(jnp.maximum(conv_valid(t, pp[name + "_w"]) + pp[name + "_b"], 0.0))
        flat = t.reshape(1, -1)                              # (1, Lf*Cf), (l, c) order
        xts.append(jnp.maximum(flat @ pp["fc_xt_w"] + pp["fc_xt_b"], 0.0))
    xt = jnp.concatenate(xts, axis=0)

    xc = jnp.concatenate([xg, xt], axis=1).astype(bf16)
    h = jnp.maximum(jnp.dot(xc, pp["fc1_w"], preferred_element_type=f32) + pp["fc1_b"], 0.0)
    h = jnp.maximum(jnp.dot(h.astype(bf16), pp["fc2_w"], preferred_element_type=f32)
                    + pp["fc2_b"], 0.0)
    return jnp.dot(h, pp["out_w"], preferred_element_type=f32) + pp["out_b"]


def _probe_roll_semantics():
    """True iff pltpu.roll follows the jnp.roll shift convention on this build."""
    def kern(x_ref, o_ref):
        o_ref[...] = pltpu.roll(x_ref[...], shift=1, axis=0)
    x = jnp.arange(8 * 128, dtype=jnp.float32).reshape(8, 128)
    y = pl.pallas_call(kern, out_shape=jax.ShapeDtypeStruct((8, 128), jnp.float32))(x)
    return bool(jnp.allclose(y, jnp.roll(x, 1, axis=0)))


# ----------------------------- main -----------------------------------------------
if __name__ == "__main__":
    _ROLL_LIKE_JNP = _probe_roll_semantics()

    key = jax.random.PRNGKey(0)
    k_p, k_x, k_s = jax.random.split(key, 3)

    params = prepare_params(init_params(k_p))
    consts = build_constants()
    adj, bmask, bmask_t = build_graph_structure()
    inv_counts = 1.0 / jnp.sum(bmask, axis=1, keepdims=True)
    graph_x = jax.random.normal(k_x, (N_NODES, CONFIG["graph_features_dim"]),
                                dtype=jnp.float32)
    seq_embed = jax.random.normal(k_s, (N_GRAPHS, SEQ_LEN, CONFIG["seq_embed_dim"]),
                                  dtype=jnp.float32)

    out = dgsdta_forward(params, consts, graph_x, adj, bmask, bmask_t,
                         inv_counts, seq_embed)
    out = jax.block_until_ready(out)
    assert out.shape == (N_GRAPHS, 1)
    assert bool(jnp.all(jnp.isfinite(out)))

    # Numerical check against a pure-JAX reference (same bf16 casts; loose tolerance
    # covers the approx-reciprocal softmax and accumulation-order differences).
    ref = jax.block_until_ready(
        jax.jit(reference_forward)(params, graph_x, adj, bmask, bmask_t,
                                   inv_counts, seq_embed))
    assert np.allclose(np.asarray(out), np.asarray(ref), rtol=8e-2, atol=4e-2), (
        np.asarray(out), np.asarray(ref))

    print("KERNEL_OK")
</pallas_src>

<mosaic_0001>
module attributes {stable_mosaic.version = 11 : i64} {
  func.func @kern(%arg0: memref<8x128xf32, #tpu.memory_space<vmem>>, %arg1: memref<8x128xf32, #tpu.memory_space<vmem>>) attributes {dimension_semantics = [], scalar_prefetch = 0 : i64, scratch_operands = 0 : i64, tpu.core_type = #tpu.core_type<tc>} {
    %c0 = arith.constant 0 : index
    %c0_0 = arith.constant 0 : index
    %0 = vector.load %arg0[%c0, %c0_0] : memref<8x128xf32, #tpu.memory_space<vmem>>, vector<8x128xf32>
    %c1_i32 = arith.constant 1 : i32
    %1 = tpu.dynamic_rotate %0 by %c1_i32 dim 0 : vector<8x128xf32>, i32 -> vector<8x128xf32>
    %c0_1 = arith.constant 0 : index
    %c0_2 = arith.constant 0 : index
    %2 = vector.load %arg1[%c0_1, %c0_2] : memref<8x128xf32, #tpu.memory_space<vmem>>, vector<8x128xf32>
    tpu.vector_store %arg1[%c0_1, %c0_2], %1 {strides = array<i32>} : memref<8x128xf32, #tpu.memory_space<vmem>>, vector<8x128xf32>,
    return
  }
}

</mosaic_0001>

<bundles_post_ra>
// kernel: tpu_custom_call.1
= control target key start
LH: loop header
LB: loop body
LE: loop exit
PB: predicated region body
PF: predicated region fallthrough
CT: control target
= control target key end

     0   :  { %6 = vsyncpa [#allocation3], 0  ;;  %s125_s0 = inlined_call_operand.hbm [shape: f32[8,128], index: 0, kind: input, shape index: {}]   ;;  %s126_s1 = inlined_call_operand.hbm [shape: f32[8,128], index: 1, kind: output, shape index: {}]  }
   0x1   :  { %7 = vsyncpa [#allocation4], 0  ;;  %s89_s6 = smov [#allocation2]   ;;  %s41_s10 = scalar_lea.hbm %s125_s0, 128 }
   0x2   :  { %s14_s7 = sshll.u32 %s89_s6, 4  ;;  %p42_p0 = scmp.ne.s32.totalorder %s125_s0, %s41_s10  ;;  %s15_s7 = int_to_ptr.vmem [resolvable:$true] %s14_s7 }
   0x3   :  { %p45_p1 = scmp.lt.u32.totalorder %s41_s10, %s125_s0 }
   0x5   :  { %p47_p2 = pnand %p45_p1, %p42_p0 }
   0x7   :  { %50 = shalt.err (!%p47_p2)
}
   0x8   :  { %s51_s15 = scalar_lea.vmem %s15_s7, 128  ;;  %p56_p4 = scmp.lt.s32.totalorder %s15_s7, %s15_s7 }
   0x9   :  { %p52_p3 = scmp.ne.s32.totalorder %s15_s7, %s51_s15  ;;  %p57_p5 = scmp.lt.s32.totalorder %s51_s15, %s51_s15 }
   0xb   :  { %p58_p6 = por %p57_p5, %p56_p4 }
   0xd   :  { %p59_p7 = pnand %p58_p6, %p52_p3 }
   0xf   :  { %62 = shalt.err (!%p59_p7)
}
  0x10   :  { %17 = dma.hbm_to_vmem [thread:$0]  %s125_s0, 128, %s15_s7, [#allocation3]  }
  0x11   :  { %85 = dma.done.wait [#allocation3], 128  }
  0x12   :  { %86 = vsyncadd [#allocation3], 4294967168  ;;  %s90_s18 = smov [#allocation5]   ;;  %v21_v0 = vld [vmem:[#allocation2] sm:$0xff] }
  0x13   :  { %s30_s19 = sshll.u32 %s90_s18, 4  ;;  %v22_v1 = vrot.slane %v21_v0, 7  ;;  %s31_s19 = int_to_ptr.vmem [resolvable:$true] %s30_s19 }
  0x14   :  { %s63_s20 = scalar_lea.vmem %s31_s19, 128  ;;  %p68_p9 = scmp.lt.s32.totalorder %s31_s19, %s31_s19 }
  0x15   :  { %23 = vst [vmem:[#allocation5] sm:$0xff] %v22_v1  ;;  %p64_p8 = scmp.ne.s32.totalorder %s31_s19, %s63_s20  ;;  %p69_p10 = scmp.lt.s32.totalorder %s63_s20, %s63_s20 }
  0x17   :  { %p70_p11 = por %p69_p10, %p68_p9 }
  0x19   :  { %p71_p12 = pnand %p70_p11, %p64_p8 }
  0x1b   :  { %74 = shalt.err (!%p71_p12)
}
  0x1c   :  { %s75_s23 = scalar_lea.hbm %s126_s1, 128 }
  0x1d   :  { %p76_p13 = scmp.ne.s32.totalorder %s126_s1, %s75_s23  ;;  %p79_p0 = scmp.lt.u32.totalorder %s75_s23, %s126_s1 }
  0x1f   :  { %p81_p1 = pnand %p79_p0, %p76_p13 }
  0x21   :  { %84 = shalt.err (!%p81_p1)
}
  0x22   :  { %33 = dma.vmem_to_hbm [thread:$0]  %s31_s19, 128, %s126_s1, [#allocation4]  }
  0x23   :  { %87 = dma.done.wait [#allocation4], 128  }
  0x24   :  { %88 = vsyncadd [#allocation4], 4294967168 }
  0x25   :  { %37 = vsyncpa [#allocation3], 1 }
  0x26   :  { %38 = vsyncpa [#allocation4], 1 }

</bundles_post_ra>
